<compile_context>
chip_gen: v5e
topology: v5e:2x2
jax: 0.10.0
libtpu: 0.0.40
codegen_flags: <defaults>
</compile_context>

<pallas_src>
import jax
import jax.numpy as jnp
from jax.experimental import pallas as pl
from jax.experimental.pallas import tpu as pltpu


def _mish_kernel(x_ref, o_ref):
    x = x_ref[...]
    xf = x.astype(jnp.float32)
    # mish(x) = x * tanh(softplus(x));  with u = 1 + e^x:
    #   tanh(softplus(x)) = (u^2 - 1) / (u^2 + 1) = e*(e+2) / (e*(e+2) + 2)
    e = jnp.exp(jnp.minimum(xf, 20.0))
    num = e * (e + 2.0)          # (1+e)^2 - 1  -> no cancellation for x << 0
    den = num + 2.0              # (1+e)^2 + 1
    # EUP approximate reciprocal + one Newton-Raphson step (cheap VPU work in a
    # mem-bound kernel) recovers ~full f32 precision.  Do NOT drop the NR step.
    r = pl.reciprocal(den, approx=True)
    r = r * (2.0 - den * r)
    y = xf * num * r
    o_ref[...] = y.astype(o_ref.dtype)


def _mish_jnp(x):
    """Plain-JAX Mish for tiny ragged tails (< 128 elements)."""
    xf = x.astype(jnp.float32)
    sp = jnp.maximum(xf, 0.0) + jnp.log1p(jnp.exp(-jnp.abs(xf)))
    return (xf * jnp.tanh(sp)).astype(x.dtype)


def _round_up(v, m):
    return ((v + m - 1) // m) * m


def mish(x, *, block_bytes=4 * 1024 * 1024, lanes=128):
    """Elementwise Mish: x * tanh(softplus(x)). Accepts any shape / float dtype."""
    orig_shape = x.shape
    orig_dtype = x.dtype
    n = x.size
    if n == 0:
        return x

    flat = x.reshape(-1)
    rem = n % lanes
    n_main = n - rem

    # Ragged (<128-element) tail handled with plain jnp — no full-tensor pad.
    tail_out = _mish_jnp(flat[n_main:]) if rem else None
    if n_main == 0:
        return tail_out.reshape(orig_shape)

    rows = n_main // lanes
    x2d = flat[:n_main].reshape(rows, lanes)

    # Dtype-aware block rows: keep ~block_bytes per block regardless of dtype,
    # rounded to a multiple of 8 (sublane constraint), floor 8.
    itemsize = jnp.dtype(orig_dtype).itemsize
    cap = max(8, (block_bytes // (lanes * itemsize)) // 8 * 8)

    if rows <= cap:
        if rows > 8:
            # Guarantee >= 2 grid steps so the parallel axis actually shards
            # across both v7x TensorCores; ~free on single-TC v5e/v6e.
            block_rows = min(cap, _round_up(pl.cdiv(rows, 2), 8))
        else:
            block_rows = rows  # full-dim block is always legal
    else:
        block_rows = cap
    grid = (pl.cdiv(rows, block_rows),)  # ragged last row-block is masked

    out2d = pl.pallas_call(
        _mish_kernel,
        out_shape=jax.ShapeDtypeStruct((rows, lanes), orig_dtype),
        grid_spec=pltpu.PrefetchScalarGridSpec(
            num_scalar_prefetch=0,
            grid=grid,
            in_specs=[pl.BlockSpec((block_rows, lanes), lambda i: (i, 0))],
            out_specs=pl.BlockSpec((block_rows, lanes), lambda i: (i, 0)),
        ),
        compiler_params=pltpu.CompilerParams(
            dimension_semantics=("parallel",),   # megacore-shardable on v7x
            # 4 MiB blocks, double-buffered in+out = 16 MiB < 32 MiB, which is
            # safe on every generation (v7x physical VMEM is 64 MiB per TC).
            vmem_limit_bytes=32 * 1024 * 1024,
        ),
    )(x2d)

    main_out = out2d.reshape(-1)
    if rem:
        # TODO(synk): the concatenate is one extra HBM pass on the (rare)
        # ragged path; could be removed with an output-aliasing epilogue.
        out_flat = jnp.concatenate([main_out, tail_out])
    else:
        out_flat = main_out
    return out_flat.reshape(orig_shape)


def mish_ref(x):
    xf = x.astype(jnp.float32)
    sp = jnp.maximum(xf, 0.0) + jnp.log1p(jnp.exp(-jnp.abs(xf)))
    return (xf * jnp.tanh(sp)).astype(x.dtype)


if __name__ == "__main__":
    key = jax.random.PRNGKey(0)

    # NCHW conv activation map, like Darknet.
    x = jax.random.normal(key, (2, 4, 16, 16), dtype=jnp.float32) * 3.0
    y = jax.block_until_ready(mish(x))
    assert y.shape == x.shape and y.dtype == x.dtype
    assert jnp.allclose(y, mish_ref(x), atol=1e-4, rtol=1e-4), "mismatch vs reference"

    # Multi-block grid with a ragged (masked) last row-block: rows=20, block=8.
    x2 = jax.random.normal(jax.random.PRNGKey(0), (2, 5, 16, 16), dtype=jnp.float32) * 3.0
    y2 = jax.block_until_ready(mish(x2, block_bytes=8 * 128 * 4))
    assert jnp.allclose(y2, mish_ref(x2), atol=1e-4, rtol=1e-4), "ragged-block mismatch"

    # Pure-jnp tail path (size < 128).
    x3 = jax.random.normal(jax.random.PRNGKey(0), (3, 5, 7), dtype=jnp.float32) * 3.0
    y3 = jax.block_until_ready(mish(x3))
    assert jnp.allclose(y3, mish_ref(x3), atol=1e-4, rtol=1e-4), "tail-only mismatch"

    # Aligned prefix + jnp tail path (size % 128 != 0, size > 128).
    x4 = jax.random.normal(jax.random.PRNGKey(0), (3, 7, 19), dtype=jnp.float32) * 3.0
    y4 = jax.block_until_ready(mish(x4))
    assert jnp.allclose(y4, mish_ref(x4), atol=1e-4, rtol=1e-4), "prefix+tail mismatch"

    # Dtype-aware blocking: bf16 input.
    x5 = (jax.random.normal(jax.random.PRNGKey(0), (2, 4, 16, 16), dtype=jnp.float32) * 3.0
          ).astype(jnp.bfloat16)
    y5 = jax.block_until_ready(mish(x5))
    assert y5.dtype == jnp.bfloat16
    assert jnp.allclose(y5.astype(jnp.float32), mish_ref(x5).astype(jnp.float32),
                        atol=2e-2, rtol=2e-2), "bf16 mismatch"

    # Extreme-magnitude values: the e*(e+2) numerator avoids cancellation for x << 0.
    x6 = jnp.concatenate([
        jnp.array([-1e4, -1e3, -100.0, -50.0, -20.0, -1.0, 0.0,
                   1.0, 20.0, 50.0, 100.0, 1e3, 1e4], dtype=jnp.float32),
        jnp.linspace(-30.0, 30.0, 115, dtype=jnp.float32),
    ])
    y6 = jax.block_until_ready(mish(x6))
    assert jnp.allclose(y6, mish_ref(x6), atol=1e-4, rtol=1e-4), "extreme-value mismatch"

    print("KERNEL_OK")
</pallas_src>

<mosaic_0001>
module attributes {stable_mosaic.version = 11 : i64} {
  func.func @_mish_kernel(%arg0: i32, %arg1: memref<8x128xf32, #tpu.memory_space<vmem>>, %arg2: memref<8x128xf32, #tpu.memory_space<vmem>>) attributes {dimension_semantics = [#tpu.dimension_semantics<parallel>], iteration_bounds = array<i64: 2>, scalar_prefetch = 0 : i64, scratch_operands = 0 : i64, tpu.core_type = #tpu.core_type<tc>, window_params = [{transform_indices = @transform_0, window_bounds = array<i64: 8, 128>}, {transform_indices = @transform_1, window_bounds = array<i64: 8, 128>}]} {
    %c0 = arith.constant 0 : index
    %c0_0 = arith.constant 0 : index
    %0 = vector.load %arg1[%c0, %c0_0] : memref<8x128xf32, #tpu.memory_space<vmem>>, vector<8x128xf32>
    %cst = arith.constant 2.000000e+01 : f32
    %1 = vector.broadcast %cst : f32 to vector<8x128xf32>
    %2 = arith.minimumf %0, %1 : vector<8x128xf32>
    %3 = math.exp %2 : vector<8x128xf32>
    %cst_1 = arith.constant 2.000000e+00 : f32
    %4 = vector.broadcast %cst_1 : f32 to vector<8x128xf32>
    %5 = arith.addf %3, %4 : vector<8x128xf32>
    %6 = arith.mulf %3, %5 : vector<8x128xf32>
    %cst_2 = arith.constant 2.000000e+00 : f32
    %7 = vector.broadcast %cst_2 : f32 to vector<8x128xf32>
    %8 = arith.addf %6, %7 : vector<8x128xf32>
    %9 = tpu.reciprocal %8 {approx = true} : vector<8x128xf32> -> vector<8x128xf32>
    %10 = arith.mulf %8, %9 : vector<8x128xf32>
    %cst_3 = arith.constant 2.000000e+00 : f32
    %11 = vector.broadcast %cst_3 : f32 to vector<8x128xf32>
    %12 = arith.subf %11, %10 : vector<8x128xf32>
    %13 = arith.mulf %9, %12 : vector<8x128xf32>
    %14 = arith.mulf %0, %6 : vector<8x128xf32>
    %15 = arith.mulf %14, %13 : vector<8x128xf32>
    %c0_4 = arith.constant 0 : index
    %c0_5 = arith.constant 0 : index
    %16 = vector.load %arg2[%c0_4, %c0_5] : memref<8x128xf32, #tpu.memory_space<vmem>>, vector<8x128xf32>
    tpu.vector_store %arg2[%c0_4, %c0_5], %15 {strides = array<i32>} : memref<8x128xf32, #tpu.memory_space<vmem>>, vector<8x128xf32>,
    return
  }
  func.func @transform_0(%arg0: i32) -> (i32, i32) {
    %c0_i32 = arith.constant 0 : i32
    %c0_i32_0 = arith.constant 0 : i32
    return %arg0, %c0_i32 : i32, i32
  }
  func.func @transform_1(%arg0: i32) -> (i32, i32) {
    %c0_i32 = arith.constant 0 : i32
    %c0_i32_0 = arith.constant 0 : i32
    return %arg0, %c0_i32 : i32, i32
  }
}

</mosaic_0001>

<bundles_post_ra>
// kernel: tpu_custom_call.1
= control target key start
LH: loop header
LB: loop body
LE: loop exit
PB: predicated region body
PF: predicated region fallthrough
CT: control target
= control target key end

     0   :  { %6 = vsyncpa [#allocation3], 0  ;;  %s531_s0 = inlined_call_operand.hbm [shape: f32[16,128], index: 0, kind: input, shape index: {}]   ;;  %s532_s1 = inlined_call_operand.hbm [shape: f32[16,128], index: 1, kind: output, shape index: {}]  }
   0x1   :  { %8 = vsyncpa [#allocation3 + $0x1], 0 }
   0x2   :  { %9 = vsyncpa [#allocation4], 0 }
   0x3   :  { %11 = vsyncpa [#allocation4 + $0x1], 0  ;;  %s404_s6 = smov 0   ;;  %s406_s7 = smov 0  }
   0x4   :  { %s408_s8 = smov 0   ;;  %s410_s9 = smov 0  }
   0x5 LB: > { %s425_s10 = sadd.s32 4294967295, %s392_s9   ;;  %s234_s11 = sadd.s32 4294967294, %s392_s9   ;;  %s392_s9 = sphi %s410_s9, %s542_s9   ;;  %s388_s8 = sphi %s408_s8, %s541_s8   ;;  %s384_s7 = sphi %s406_s7, %s540_s7   ;;  %s380_s6 = sphi %s404_s6, %s539_s6  }
   0x6   : > { %s429_s12 = sadd.s32 1, %s392_s9   ;;  %s24_s13 = sadd.s32 1, %s388_s8 }
   0x7   : > { %s21_s14 = ssub.s32 %s392_s9, %s429_s12  ;;  %p31_p0 = scmp.ne.s32.totalorder %s388_s8, %s384_s7 }
   0x8   : > { %p22_p1 = scmp.eq.s32.totalorder %s21_s14, 0  ;;  %p32_p2 = scmp.eq.s32.totalorder %s392_s9, 0 }
   0x9   : > { %p37_p3 = scmp.ne.s32.totalorder %s384_s7, %s380_s6  ;;  %p38_p4 = scmp.eq.s32.totalorder %s425_s10, 0 }
   0xa   : > { %s441_s15 = scalar_select %p22_p1, %s388_s8, %s24_s13  }
   0xb   : > { %p443_p5 = por %p32_p2, %p31_p0  ;;  %p447_p6 = por %p38_p4, %p37_p3 }
   0xc   : > { %p61_p7 = scmp.eq.s32.totalorder %s425_s10, 1  ;;  %p67_p8 = scmp.eq.s32.totalorder %s234_s11, 1 }
   0xd   : > { %p258_p10 = scmp.lt.s32.totalorder %s392_s9, 2  ;;  %s87_s20 = sand.u32 1, %s388_s8  }
   0xe   : > { %p454_p11 = por %p61_p7, %p31_p0  ;;  %p458_p12 = por %p67_p8, %p37_p3 }
   0xf   : > { %s238_s21 = sshll.u32 %s392_s9, 3  ;;  %s237_s22 = sshll.u32 %s87_s20, 3 }
  0x10   : > { %s95_s25 = scalar_lea.hbm %s531_s0, %s238_s21  ;;  %s91_s27 = scalar_lea.vmem [#allocation2], %s237_s22 }
  0x11   : > { %s97_s26 = sshll.u32 %s95_s25, 4  ;;  %s99_s28 = sshll.u32 %s91_s27, 4  ;;  %s98_s26 = int_to_ptr.hbm [resolvable:$true] %s97_s26  ;;  %s100_s28 = int_to_ptr.vmem [resolvable:$true] %s99_s28 }
  0x12   : > { %p469_p13 = pnand %p258_p10, %p443_p5  ;;  %p239_p0 = scmp.ge.s32.totalorder %s392_s9, 1 }
  0x13   : > { %p104_p1 = scmp.lt.s32.totalorder %s392_s9, 3  ;;  %s88_s30 = scalar_lea.sflag [#allocation3], %s87_s20 }
  0x14   : > { %s296_s2 = sshra.s32 %s98_s26, 4  ;;  %p300_p3 = pneg %p469_p13  ;;  %s297_s2 = int_to_ptr.hbm [resolvable:$true] %s296_s2 }
  0x15   : > { %s298_s3 = scalar_lea.hbm %s297_s2, 8  ;;  %s303_s11 = scalar_lea.hbm %s531_s0, 16 }
  0x16   : > { %p299_p2 = scmp.ne.s32.totalorder %s297_s2, %s298_s3  ;;  %p304_p5 = scmp.lt.s32.totalorder %s297_s2, %s531_s0 }
  0x17   : > { %p305_p8 = scmp.lt.s32.totalorder %s303_s11, %s298_s3 }
  0x18   : > { %p301_p4 = pnand %p300_p3, %p299_p2 }
  0x19   : > { %p306_p10 = por %p305_p8, %p304_p5 }
  0x1a   : > { %p302_p7 = pneg %p301_p4 }
  0x1c   : > { %p307_p9 = pnand %p306_p10, %p302_p7 }
  0x1e   : > { %310 = shalt.err (!%p307_p9)
}
  0x1f   : > { %253 = dma.hbm_to_vmem [thread:$0]  (!%p469_p13), %s98_s26, 128, %s100_s28, %s88_s30  }
  0x20   : > { %p105_p2 = pnand %p239_p0, %p104_p1 }
  0x21   : > { %s490_s16 = sand.u32 (!%p105_p2), 1, %s384_s7  }
  0x22   : > { %108 = sbr.rel (%p105_p2) target bundleno = 76 (0x4c), region = 24  ;;  %s240_s20 = sshll.u32 (!%p105_p2), %s490_s16, 3 }
  0x23   : > { %s111_s21 = scalar_lea.sflag (!%p105_p2), [#allocation3], %s490_s16  ;;  %s114_s22 = scalar_lea.vmem (!%p105_p2), [#allocation2], %s240_s20 }
  0x27   : > { %371 = dma.done.wait (%p447_p6), %s111_s21, 128  }
  0x28   : > { %373 = vsyncadd (%p447_p6), %s111_s21, 4294967168  ;;  %v134_v0 = vld [vmem:[%s114_s22] sm:$0xff]  ;;  %s243_s23 = sshll.u32 %s425_s10, 3  ;;  %s133_s17 = scalar_lea.vmem [#allocation5], %s240_s20 }
  0x29   : > { %v135_v1 = vmin.f32 %v134_v0, 20.0  ;;  %s159_s26 = scalar_lea.hbm %s532_s1, %s243_s23  ;;  %s161_s27 = sshll.u32 %s133_s17, 4  ;;  %s162_s27 = int_to_ptr.vmem [resolvable:$true] %s161_s27 }
  0x2a   : > { %s163_s28 = sshll.u32 %s159_s26, 4  ;;  %s149_s29 = scalar_lea.sflag [#allocation4], %s490_s16  ;;  %s164_s28 = int_to_ptr.hbm [resolvable:$true] %s163_s28 }
  0x2b   : > { %v136_v2 = vmul.f32 1.442695, %v135_v1  ;;  %s340_s30 = sshra.s32 %s164_s28, 4  ;;  %s346_s4 = scalar_lea.hbm %s532_s1, 16  ;;  %s341_s30 = int_to_ptr.hbm [resolvable:$true] %s340_s30 }
  0x2c   : > { %s342_s10 = scalar_lea.hbm %s341_s30, 8  ;;  %p347_p0 = scmp.lt.s32.totalorder %s341_s30, %s532_s1 }
  0x2d   : > { %292 = vpow2.f32 %v136_v2  ;;  %p343_p6 = scmp.ne.s32.totalorder %s341_s30, %s342_s10  ;;  %p348_p1 = scmp.lt.s32.totalorder %s346_s4, %s342_s10 }
  0x2f   : > { %p344_p9 = pnand %p343_p6, %p454_p11  ;;  %p349_p3 = por %p348_p1, %p347_p0 }
  0x31   : > { %p345_p13 = pneg %p344_p9 }
  0x33   : > { %v293_v3 = vpop.eup %292  ;;  %p350_p4 = pnand %p349_p3, %p345_p13 }
  0x34   : > { %v138_v4 = vadd.f32 2.0, %v293_v3 }
  0x36   : > { %v139_v5 = vmul.f32 %v293_v3, %v138_v4 }
  0x38   : > { %v140_v6 = vadd.f32 2.0, %v139_v5  ;;  %v145_v10 = vmul.f32 %v139_v5, %v134_v0 }
  0x3a   : > { %294 = vrcp.f32 %v140_v6 }
  0x40   : > { %v295_v7 = vpop.eup %294 }
  0x41   : > { %v142_v8 = vmul.f32 %v295_v7, %v140_v6 }
  0x43   : > { %v143_v9 = vsub.f32 2.0, %v142_v8 }
  0x45   : > { %v144_v11 = vmul.f32 %v295_v7, %v143_v9 }
  0x47   : > { %v146_v12 = vmul.f32 %v145_v10, %v144_v11 }
  0x49   : > { %147 = vst [vmem:[%s133_s17] sm:$0xff] %v146_v12 }
  0x4a   : > { %353 = shalt.err (!%p350_p4)
}
  0x4b   : > { %248 = dma.vmem_to_hbm [thread:$0]  (%p454_p11), %s162_s27, 128, %s164_s28, %s149_s29  }
  0x4c PF: > { %s175_s13 = sand.u32 1, %s380_s6   ;;  %p538_p7 = scmp.ge.s32.totalorder %s392_s9, 2 }
  0x4d   : > { %s176_s14 = scalar_lea.sflag [#allocation4], %s175_s13 }
  0x4e   : > { %p255_p5 = pnand %p538_p7, %p458_p12 }
  0x50   : > { %p256_p8 = pneg %p255_p5 }
  0x52   : > { %375 = dma.done.wait (%p256_p8), %s176_s14, 128  }
  0x53   : > { %377 = vsyncadd (%p256_p8), %s176_s14, 4294967168  ;;  %p14_p10 = scmp.ge.s32.totalorder %s429_s12, 4   ;;  %s539_s6 = smov %s384_s7 }
  0x54   : > { %s540_s7 = smov %s388_s8  ;;  %s541_s8 = smov %s441_s15 }
  0x55   : > { %s542_s9 = smov %s429_s12  ;;  %16 = sbr.rel (!%p14_p10) target bundleno = 5 (0x5), region = 69 }
  0x5a   :  { %182 = vsyncpa [#allocation3], 1 }
  0x5b   :  { %184 = vsyncpa [#allocation3 + $0x1], 1 }
  0x5c   :  { %185 = vsyncpa [#allocation4], 1 }
  0x5d   :  { %187 = vsyncpa [#allocation4 + $0x1], 1 }

</bundles_post_ra>
